<compile_context>
chip_gen: v7x
topology: tpu7x:2x2x1
jax: 0.10.0
libtpu: 0.0.40
codegen_flags: <defaults>
</compile_context>

<pallas_src>
import jax
import jax.numpy as jnp
from jax.experimental import pallas as pl
from jax.experimental.pallas import tpu as pltpu


def _round_up(n: int, m: int) -> int:
    return ((n + m - 1) // m) * m


def mlp_kernel(x_ref,
               w1_ref, b1_ref,
               w2_ref, b2_ref,
               w3_ref, b3_ref,
               w4_ref, b4_ref,
               o_ref):
    # Feature-major: x_ref is [30, TB] bf16 with the batch tile on the lane axis.
    x = x_ref[...]                                                      # bf16 [30, TB]

    # Layer 1: [32,30] @ [30,TB] -> f32 [32,TB]
    h1 = jnp.dot(w1_ref[...], x, preferred_element_type=jnp.float32) + b1_ref[...]
    h1 = jnp.maximum(h1, 0.0)              # ReLU; Dropout(0.2) = identity (eval)

    # Layer 2: [16,32] @ [32,TB] -> f32 [16,TB]
    h2 = jnp.dot(w2_ref[...], h1.astype(jnp.bfloat16),
                 preferred_element_type=jnp.float32) + b2_ref[...]
    h2 = jnp.maximum(h2, 0.0)              # ReLU; Dropout(0.1) = identity (eval)

    # Layer 3: [8,16] @ [16,TB] -> f32 [8,TB]
    h3 = jnp.dot(w3_ref[...], h2.astype(jnp.bfloat16),
                 preferred_element_type=jnp.float32) + b3_ref[...]
    h3 = jnp.maximum(h3, 0.0)              # ReLU

    # Layer 4: [1,8] @ [8,TB] -> f32 [1,TB]; sigmoid in f32 (exp + recip on EUP)
    z = jnp.dot(w4_ref[...], h3.astype(jnp.bfloat16),
                preferred_element_type=jnp.float32) + b4_ref[...]
    o_ref[...] = jax.nn.sigmoid(z)          # lane-dense [1, TB] store


def mlp_forward(x, params, *, tile_b=512):
    """x: [B, 30] float32.  params: w{i} as [out, in] (PyTorch layout), b{i} as [out, 1]."""
    B, F = x.shape
    assert F == 30

    # Lane-dense tile: multiple of 128; don't overshoot small batches.
    tile_b = max(128, min(_round_up(tile_b, 128), _round_up(B, 128)))
    B_pad = _round_up(B, tile_b)

    # Pad rows, cast to bf16, go feature-major.  All layout plumbing, fused by XLA.
    x_t = jnp.pad(x, ((0, B_pad - B), (0, 0))).astype(jnp.bfloat16).T   # [30, B_pad]

    w = [params[f"w{i}"].astype(jnp.bfloat16) for i in range(1, 5)]     # [out, in] bf16
    b = [params[f"b{i}"].astype(jnp.float32) for i in range(1, 5)]      # [out, 1]  f32

    grid = (B_pad // tile_b,)

    # Grid-invariant params: constant index_map -> fetched once, stay resident in VMEM.
    def const(arr):
        return pl.BlockSpec(arr.shape, lambda i: (0,) * arr.ndim)

    out = pl.pallas_call(
        mlp_kernel,
        out_shape=jax.ShapeDtypeStruct((1, B_pad), jnp.float32),
        grid=grid,
        in_specs=[
            pl.BlockSpec((F, tile_b), lambda i: (0, i)),   # x tile: batch on lanes
            const(w[0]), const(b[0]),
            const(w[1]), const(b[1]),
            const(w[2]), const(b[2]),
            const(w[3]), const(b[3]),
        ],
        out_specs=pl.BlockSpec((1, tile_b), lambda i: (0, i)),   # lane-dense output
        compiler_params=pltpu.CompilerParams(
            dimension_semantics=("parallel",)),                  # megacore on v7x
    )(x_t, w[0], b[0], w[1], b[1], w[2], b[2], w[3], b[3])

    return out[0, :B].reshape(B, 1)


def init_params(key):
    """Deterministic init mimicking nn.Linear defaults (uniform +-1/sqrt(fan_in)).
    Weights are kept in PyTorch [out, in] layout; biases as [out, 1] columns."""
    dims = [(30, 32), (32, 16), (16, 8), (8, 1)]
    params = {}
    for idx, (fin, fout) in enumerate(dims, start=1):
        key, kw, kb = jax.random.split(key, 3)
        bound = 1.0 / jnp.sqrt(float(fin))
        params[f"w{idx}"] = jax.random.uniform(
            kw, (fout, fin), jnp.float32, minval=-bound, maxval=bound)
        params[f"b{idx}"] = jax.random.uniform(
            kb, (fout, 1), jnp.float32, minval=-bound, maxval=bound)
    return params


def reference_forward_f32(x, params):
    """Pure f32 reference (exact module semantics, eval mode)."""
    h = x
    for i in range(1, 4):
        h = jnp.maximum(h @ params[f"w{i}"].T + params[f"b{i}"][:, 0], 0.0)
    z = h @ params["w4"].T + params["b4"][:, 0]
    return jax.nn.sigmoid(z)


def reference_forward_bf16(x, params):
    """Reference emulating the kernel's mixed precision (bf16 operands, f32 accum)."""
    h = x.astype(jnp.bfloat16)
    for i in range(1, 4):
        w = params[f"w{i}"].astype(jnp.bfloat16)
        hf = jnp.dot(h, w.T, preferred_element_type=jnp.float32) + params[f"b{i}"][:, 0]
        h = jnp.maximum(hf, 0.0).astype(jnp.bfloat16)
    w4 = params["w4"].astype(jnp.bfloat16)
    z = jnp.dot(h, w4.T, preferred_element_type=jnp.float32) + params["b4"][:, 0]
    return jax.nn.sigmoid(z)


if __name__ == "__main__":
    key = jax.random.PRNGKey(0)
    key, kx = jax.random.split(key)

    B = 8
    x = jax.random.normal(kx, (B, 30), jnp.float32)
    params = init_params(key)

    out = jax.block_until_ready(mlp_forward(x, params))

    ref_mp = reference_forward_bf16(x, params)   # matches kernel precision
    ref_f32 = reference_forward_f32(x, params)   # exact module math

    assert out.shape == (B, 1)
    assert jnp.allclose(out, ref_mp, atol=1e-3, rtol=1e-3), float(jnp.max(jnp.abs(out - ref_mp)))
    assert jnp.allclose(out, ref_f32, atol=5e-2, rtol=5e-2), float(jnp.max(jnp.abs(out - ref_f32)))

    print("KERNEL_OK")
</pallas_src>

<mosaic_0001>
module attributes {stable_mosaic.version = 11 : i64} {
  func.func @mlp_kernel(%arg0: i32, %arg1: memref<30x128xbf16, #tpu.memory_space<vmem>>, %arg2: memref<32x30xbf16, #tpu.memory_space<vmem>>, %arg3: memref<32x1xf32, #tpu.memory_space<vmem>>, %arg4: memref<16x32xbf16, #tpu.memory_space<vmem>>, %arg5: memref<16x1xf32, #tpu.memory_space<vmem>>, %arg6: memref<8x16xbf16, #tpu.memory_space<vmem>>, %arg7: memref<8x1xf32, #tpu.memory_space<vmem>>, %arg8: memref<1x8xbf16, #tpu.memory_space<vmem>>, %arg9: memref<1x1xf32, #tpu.memory_space<vmem>>, %arg10: memref<1x128xf32, #tpu.memory_space<vmem>>) attributes {dimension_semantics = [#tpu.dimension_semantics<parallel>], iteration_bounds = array<i64: 1>, scalar_prefetch = 0 : i64, scratch_operands = 0 : i64, tpu.core_type = #tpu.core_type<tc>, window_params = [{transform_indices = @transform_0, window_bounds = array<i64: 30, 128>}, {pipeline_mode = #tpu.pipeline_mode<synchronous>, transform_indices = @transform_1, window_bounds = array<i64: 32, 30>}, {pipeline_mode = #tpu.pipeline_mode<synchronous>, transform_indices = @transform_2, window_bounds = array<i64: 32, 1>}, {pipeline_mode = #tpu.pipeline_mode<synchronous>, transform_indices = @transform_3, window_bounds = array<i64: 16, 32>}, {pipeline_mode = #tpu.pipeline_mode<synchronous>, transform_indices = @transform_4, window_bounds = array<i64: 16, 1>}, {pipeline_mode = #tpu.pipeline_mode<synchronous>, transform_indices = @transform_5, window_bounds = array<i64: 8, 16>}, {pipeline_mode = #tpu.pipeline_mode<synchronous>, transform_indices = @transform_6, window_bounds = array<i64: 8, 1>}, {pipeline_mode = #tpu.pipeline_mode<synchronous>, transform_indices = @transform_7, window_bounds = array<i64: 1, 8>}, {pipeline_mode = #tpu.pipeline_mode<synchronous>, transform_indices = @transform_8, window_bounds = array<i64: 1, 1>}, {transform_indices = @transform_9, window_bounds = array<i64: 1, 128>}]} {
    %c0 = arith.constant 0 : index
    %c0_0 = arith.constant 0 : index
    %0 = vector.load %arg1[%c0, %c0_0] : memref<30x128xbf16, #tpu.memory_space<vmem>>, vector<30x128xbf16>
    %c0_1 = arith.constant 0 : index
    %c0_2 = arith.constant 0 : index
    %1 = vector.load %arg2[%c0_1, %c0_2] : memref<32x30xbf16, #tpu.memory_space<vmem>>, vector<32x30xbf16>
    %cst = arith.constant dense<0.000000e+00> : vector<32x128xf32>
    %2 = tpu.matmul %1, %0, %cst {dimension_numbers = #tpu.dot_dimension_numbers<[1], [0], [0], [1], [0, 0, 1, 1], [], []>} : vector<32x30xbf16>, vector<30x128xbf16>, vector<32x128xf32> -> vector<32x128xf32>
    %c0_3 = arith.constant 0 : index
    %c0_4 = arith.constant 0 : index
    %3 = vector.load %arg3[%c0_3, %c0_4] : memref<32x1xf32, #tpu.memory_space<vmem>>, vector<32x1xf32>
    %4 = vector.broadcast %3 : vector<32x1xf32> to vector<32x128xf32>
    %5 = arith.addf %2, %4 : vector<32x128xf32>
    %cst_5 = arith.constant 0.000000e+00 : f32
    %6 = vector.broadcast %cst_5 : f32 to vector<32x128xf32>
    %7 = arith.maximumf %5, %6 : vector<32x128xf32>
    %c0_6 = arith.constant 0 : index
    %c0_7 = arith.constant 0 : index
    %8 = vector.load %arg4[%c0_6, %c0_7] : memref<16x32xbf16, #tpu.memory_space<vmem>>, vector<16x32xbf16>
    %9 = arith.truncf %7 : vector<32x128xf32> to vector<32x128xbf16>
    %cst_8 = arith.constant dense<0.000000e+00> : vector<16x128xf32>
    %10 = tpu.matmul %8, %9, %cst_8 {dimension_numbers = #tpu.dot_dimension_numbers<[1], [0], [0], [1], [0, 0, 1, 1], [], []>} : vector<16x32xbf16>, vector<32x128xbf16>, vector<16x128xf32> -> vector<16x128xf32>
    %c0_9 = arith.constant 0 : index
    %c0_10 = arith.constant 0 : index
    %11 = vector.load %arg5[%c0_9, %c0_10] : memref<16x1xf32, #tpu.memory_space<vmem>>, vector<16x1xf32>
    %12 = vector.broadcast %11 : vector<16x1xf32> to vector<16x128xf32>
    %13 = arith.addf %10, %12 : vector<16x128xf32>
    %cst_11 = arith.constant 0.000000e+00 : f32
    %14 = vector.broadcast %cst_11 : f32 to vector<16x128xf32>
    %15 = arith.maximumf %13, %14 : vector<16x128xf32>
    %c0_12 = arith.constant 0 : index
    %c0_13 = arith.constant 0 : index
    %16 = vector.load %arg6[%c0_12, %c0_13] : memref<8x16xbf16, #tpu.memory_space<vmem>>, vector<8x16xbf16>
    %17 = arith.truncf %15 : vector<16x128xf32> to vector<16x128xbf16>
    %cst_14 = arith.constant dense<0.000000e+00> : vector<8x128xf32>
    %18 = tpu.matmul %16, %17, %cst_14 {dimension_numbers = #tpu.dot_dimension_numbers<[1], [0], [0], [1], [0, 0, 1, 1], [], []>} : vector<8x16xbf16>, vector<16x128xbf16>, vector<8x128xf32> -> vector<8x128xf32>
    %c0_15 = arith.constant 0 : index
    %c0_16 = arith.constant 0 : index
    %19 = vector.load %arg7[%c0_15, %c0_16] : memref<8x1xf32, #tpu.memory_space<vmem>>, vector<8x1xf32>
    %20 = vector.broadcast %19 : vector<8x1xf32> to vector<8x128xf32>
    %21 = arith.addf %18, %20 : vector<8x128xf32>
    %cst_17 = arith.constant 0.000000e+00 : f32
    %22 = vector.broadcast %cst_17 : f32 to vector<8x128xf32>
    %23 = arith.maximumf %21, %22 : vector<8x128xf32>
    %c0_18 = arith.constant 0 : index
    %c0_19 = arith.constant 0 : index
    %24 = vector.load %arg8[%c0_18, %c0_19] : memref<1x8xbf16, #tpu.memory_space<vmem>>, vector<1x8xbf16>
    %25 = arith.truncf %23 : vector<8x128xf32> to vector<8x128xbf16>
    %cst_20 = arith.constant dense<0.000000e+00> : vector<1x128xf32>
    %26 = tpu.matmul %24, %25, %cst_20 {dimension_numbers = #tpu.dot_dimension_numbers<[1], [0], [0], [1], [0, 0, 1, 1], [], []>} : vector<1x8xbf16>, vector<8x128xbf16>, vector<1x128xf32> -> vector<1x128xf32>
    %c0_21 = arith.constant 0 : index
    %c0_22 = arith.constant 0 : index
    %27 = vector.load %arg9[%c0_21, %c0_22] : memref<1x1xf32, #tpu.memory_space<vmem>>, vector<1x1xf32>
    %28 = vector.broadcast %27 : vector<1x1xf32> to vector<1x128xf32>
    %29 = arith.addf %26, %28 : vector<1x128xf32>
    %30 = arith.negf %29 : vector<1x128xf32>
    %31 = math.exp %30 : vector<1x128xf32>
    %cst_23 = arith.constant 1.000000e+00 : f32
    %32 = vector.broadcast %cst_23 : f32 to vector<1x128xf32>
    %33 = arith.addf %32, %31 : vector<1x128xf32>
    %34 = arith.divf %32, %33 : vector<1x128xf32>
    %c0_24 = arith.constant 0 : index
    %c0_25 = arith.constant 0 : index
    %35 = vector.load %arg10[%c0_24, %c0_25] : memref<1x128xf32, #tpu.memory_space<vmem>>, vector<1x128xf32>
    tpu.vector_store %arg10[%c0_24, %c0_25], %34 {strides = array<i32>} : memref<1x128xf32, #tpu.memory_space<vmem>>, vector<1x128xf32>,
    return
  }
  func.func @transform_0(%arg0: i32) -> (i32, i32) {
    %c0_i32 = arith.constant 0 : i32
    %c0_i32_0 = arith.constant 0 : i32
    return %c0_i32, %arg0 : i32, i32
  }
  func.func @transform_1(%arg0: i32) -> (i32, i32) {
    %c0_i32 = arith.constant 0 : i32
    %c0_i32_0 = arith.constant 0 : i32
    %c0_i32_1 = arith.constant 0 : i32
    return %c0_i32, %c0_i32_0 : i32, i32
  }
  func.func @transform_2(%arg0: i32) -> (i32, i32) {
    %c0_i32 = arith.constant 0 : i32
    %c0_i32_0 = arith.constant 0 : i32
    %c0_i32_1 = arith.constant 0 : i32
    return %c0_i32, %c0_i32_0 : i32, i32
  }
  func.func @transform_3(%arg0: i32) -> (i32, i32) {
    %c0_i32 = arith.constant 0 : i32
    %c0_i32_0 = arith.constant 0 : i32
    %c0_i32_1 = arith.constant 0 : i32
    return %c0_i32, %c0_i32_0 : i32, i32
  }
  func.func @transform_4(%arg0: i32) -> (i32, i32) {
    %c0_i32 = arith.constant 0 : i32
    %c0_i32_0 = arith.constant 0 : i32
    %c0_i32_1 = arith.constant 0 : i32
    return %c0_i32, %c0_i32_0 : i32, i32
  }
  func.func @transform_5(%arg0: i32) -> (i32, i32) {
    %c0_i32 = arith.constant 0 : i32
    %c0_i32_0 = arith.constant 0 : i32
    %c0_i32_1 = arith.constant 0 : i32
    return %c0_i32, %c0_i32_0 : i32, i32
  }
  func.func @transform_6(%arg0: i32) -> (i32, i32) {
    %c0_i32 = arith.constant 0 : i32
    %c0_i32_0 = arith.constant 0 : i32
    %c0_i32_1 = arith.constant 0 : i32
    return %c0_i32, %c0_i32_0 : i32, i32
  }
  func.func @transform_7(%arg0: i32) -> (i32, i32) {
    %c0_i32 = arith.constant 0 : i32
    %c0_i32_0 = arith.constant 0 : i32
    %c0_i32_1 = arith.constant 0 : i32
    return %c0_i32, %c0_i32_0 : i32, i32
  }
  func.func @transform_8(%arg0: i32) -> (i32, i32) {
    %c0_i32 = arith.constant 0 : i32
    %c0_i32_0 = arith.constant 0 : i32
    %c0_i32_1 = arith.constant 0 : i32
    return %c0_i32, %c0_i32_0 : i32, i32
  }
  func.func @transform_9(%arg0: i32) -> (i32, i32) {
    %c0_i32 = arith.constant 0 : i32
    %c0_i32_0 = arith.constant 0 : i32
    return %c0_i32, %arg0 : i32, i32
  }
}

</mosaic_0001>

<bundles_post_ra>
// kernel: tpu_custom_call.1
= control target key start
LH: loop header
LB: loop body
LE: loop exit
PB: predicated region body
PF: predicated region fallthrough
CT: control target
= control target key end

     0   :  { %s561_s0 = inlined_call_operand.vmem [shape: bf16[30,128], index: 0, kind: input, shape index: {}]   ;;  %s562_s1 = inlined_call_operand.vmem [shape: bf16[32,30], index: 1, kind: input, shape index: {}]   ;;  %s563_s2 = inlined_call_operand.vmem [shape: f32[32,1], index: 2, kind: input, shape index: {}]   ;;  %s564_s3 = inlined_call_operand.vmem [shape: bf16[16,32], index: 3, kind: input, shape index: {}]   ;;  %s565_s4 = inlined_call_operand.vmem [shape: f32[16,1], index: 4, kind: input, shape index: {}]   ;;  %s566_s5 = inlined_call_operand.vmem [shape: bf16[8,16], index: 5, kind: input, shape index: {}]   ;;  %s567_s6 = inlined_call_operand.vmem [shape: f32[8,1], index: 6, kind: input, shape index: {}]   ;;  %s568_s7 = inlined_call_operand.vmem [shape: bf16[1,8], index: 7, kind: input, shape index: {}]   ;;  %s569_s8 = inlined_call_operand.<no memory space> [shape: f32[1,1], index: 8, kind: input, shape index: {}]   ;;  %s570_s9 = inlined_call_operand.hbm [shape: f32[1,128], index: 9, kind: output, shape index: {}]  }
   0x1   :  { %v14_v0 = vstv %s569_s8 }
   0x2   :  { %15 = vst [vmem:[#allocation2] sm:$0x1] %v14_v0 }
   0x3   :  { %v412_v1 = vld [vmem:[%s561_s0] sm:$0xff]   ;;  %vm96_vm0 = vcmask 1046528   ;;  %v413_v2 = vld [vmem:[%s561_s0 + $0x8] sm:$0x7f]   ;;  %vm89_vm1 = vcmask 244736   ;;  %v46_v6 = vld [vmem:[%s563_s2 + $0x10] sm:$0xff] }
   0x4   :  { %377 = vmatprep.subr.bf16.mxu0 %v412_v1  ;;  %v414_v3 = vld [vmem:[%s562_s1] sm:$0xff]   ;;  %v98_v4 = vsel %vm96_vm0, %v413_v2, 0  ;;  %v445_v7 = vmov 0   ;;  %v415_v8 = vld [vmem:[%s562_s1 + $0x8] sm:$0xff]  }
   0x5   :  { %378 = vmatpush3.bf16.msra.mxu0 %v412_v1  ;;  %381 = vmatprep.mubr.msk.bf16.mxu0 %vm89_vm1, %v414_v3  ;;  %v44_v5 = vld [vmem:[%s563_s2] sm:$0xff]  ;;  %v45_v9 = vld [vmem:[%s563_s2 + $0x8] sm:$0xff] }
   0x6   :  { %405 = vmatprep.subr.msk.bf16.mxu0 %vm96_vm0, %v413_v2  ;;  %410 = vset.pattern.permute.xlu0 %v445_v7 }
   0x7   :  { %411 = vset.pattern.permute.xlu1 %v445_v7  ;;  %50 = vperm.xlu0 %410, %v44_v5  }
   0x8   :  { %60 = vperm.xlu1 %411, %v46_v6  }
   0x9   :  { %380 = vmatpush3.bf16.msra.mxu0 %v98_v4 }
   0xa   :  { %16 = vsyncpa [#allocation4], 0  ;;  %v47_v10 = vld [vmem:[%s563_s2 + $0x18] sm:$0xff]  ;;  %v157_v11 = vld [vmem:[%s565_s4] sm:$0xff]  ;;  %v446_v15 = vmov 0.0   ;;  %vm447_vm2 = vmmov 0   ;;  %v282_v57 = vlaneseq }
   0xb   :  { %55 = vperm.xlu0 %410, %v45_v9   ;;  %v158_v12 = vld [vmem:[%s565_s4 + $0x8] sm:$0xff]  ;;  %v223_v13 = vld [vmem:[%s567_s6] sm:$0xff]  ;;  %385 = vmatprep.subr.bf16.mxu1 %v446_v15  ;;  %vm174_vm3 = vcmask 261120   ;;  %vm229_vm4 = vcmask 130048   ;;  %vm290_vm5 = vcmask 1043456   ;;  %vm286_vm6 = vcmask 64512  }
   0xc   :  { %382 = vmatmul.mubr.msk.bf16.vlgmr.msra.gmra.mrb[0].mxu0 %vm89_vm1, %v415_v8  ;;  %65 = vperm.xlu1 %411, %v47_v10   ;;  %v276_v14 = vld [vmem:[#allocation2] sm:$0x1]  ;;  %v283_v58 = vshrl.u32 %v282_v57, 7 }
   0xd   :  { %393 = vmatprep.subr.bf16.mxu0 %v446_v15  ;;  %389 = vmatprep.mubr.msk.bf16.mxu1 %vm447_vm2, %v446_v15  ;;  %v416_v34 = vld [vmem:[%s564_s3] sm:$0xff]  }
   0xe   :  { %395 = vmatprep.mubr.msk.bf16.mxu0 %vm447_vm2, %v446_v15  ;;  %v221_v46 = vld [vmem:[%s566_s5] sm:$0xf]  ;;  %v284_v59 = vsub.s32 0, %v283_v58  ;;  %s448_s5 = smov [#allocation3]  }
   0xf   :  { %161 = vperm.xlu0 %410, %v157_v11   ;;  %v274_v56 = vld [vmem:[%s568_s7] sm:$0x1]  ;;  %s347_s11 = sshll.u32 %s448_s5, 4  ;;  %s348_s11 = int_to_ptr.vmem [resolvable:$true] %s347_s11 }
  0x10   :  { %166 = vperm.xlu1 %411, %v158_v12   ;;  %s421_s7 = scalar_lea.vmem %s348_s11, 16  ;;  %s425_s12 = scalar_lea.vmem %s348_s11, 32 }
  0x11   :  { %p422_p0 = scmp.ne.s32.totalorder %s348_s11, %s421_s7  ;;  %p426_p1 = scmp.lt.s32.totalorder %s348_s11, %s348_s11 }
  0x12   :  { %p427_p2 = scmp.lt.s32.totalorder %s425_s12, %s421_s7 }
  0x13   :  { %226 = vperm.xlu0 %410, %v223_v13  }
  0x14   :  { %279 = vperm.xlu1 %411, %v276_v14   ;;  %p428_p3 = por %p427_p2, %p426_p1 }
  0x16   :  { %p429_p4 = pnand %p428_p3, %p422_p0 }
  0x86   :  { %v51_v17 = vpop.permute.xlu0 %50 }
  0x87   :  { %v61_v16 = vpop.permute.xlu1 %60 }
  0x8a   :  { %v56_v24 = vpop.permute.xlu0 %55 }
  0x8b   :  { %v66_v21 = vpop.permute.xlu1 %65 }
  0x8e   :  { %v162_v35 = vpop.permute.xlu0 %161 }
  0x8f   :  { %v167_v39 = vpop.permute.xlu1 %166 }
  0x92   :  { %v227_v47 = vpop.permute.xlu0 %226 }
  0x93   :  { %v280_v60 = vpop.permute.xlu1 %279 }
  0x94   :  { %v285_v61 = vrot.slane %v280_v60, %v284_v59 }
  0xdf   :  { %v383_v18 = vpop.f32.mrb[0].mxu0 }
  0xe0   :  { %v143_v19 = vadd.f32 %v383_v18, %v61_v16  ;;  %v134_v20 = vpop.f32.mrb[1].mxu0 }
  0xe1   :  { %v135_v22 = vadd.f32 %v134_v20, %v51_v17  ;;  %v384_v23 = vpop.f32.mrb[2].mxu0 }
  0xe2   :  { %v146_v25 = vadd.f32 %v384_v23, %v66_v21  ;;  %v137_v26 = vpop.f32.mrb[3].mxu0  ;;  %v151_v28 = vmax.f32 %v143_v19, 0.0 }
  0xe3   :  { %v138_v27 = vadd.f32 %v137_v26, %v56_v24  ;;  %v149_v30 = vmax.f32 %v135_v22, 0.0 }
  0xe4   :  { %v152_v29 = vmax.f32 %v146_v25, 0.0 }
  0xe5   :  { %v150_v31 = vmax.f32 %v138_v27, 0.0 }
  0xe6   :  { %v156_v32 = vpack.c.bf16 %v152_v29, %v151_v28 }
  0xe7   :  { %v155_v33 = vpack.c.bf16 %v150_v31, %v149_v30 }
  0xe9   :  { %386 = vmatpush3.bf16.msra.mxu1 %v155_v33 }
  0xea   :  { %387 = vmatprep.subr.bf16.mxu1 %v446_v15 }
  0xed   :  { %388 = vmatpush3.bf16.msra.mxu1 %v156_v32 }
  0xee   :  { %399 = vmatprep.subr.bf16.mxu1 %v446_v15 }
  0xf0   :  { %390 = vmatmul.mubr.msk.bf16.vlgmr.msra.gmra.mrb[0].mxu1 %vm174_vm3, %v416_v34 }
  0xf1   :  { %401 = vmatprep.mubr.msk.bf16.mxu1 %vm447_vm2, %v446_v15 }
 0x1c3   :  { %v212_v36 = vpop.f32.mrb[0].mxu1 }
 0x1c4   :  { %v213_v37 = vadd.f32 %v212_v36, %v162_v35  ;;  %v391_v38 = vpop.f32.mrb[1].mxu1 }
 0x1c5   :  { %v215_v40 = vpop.f32.mrb[2].mxu1 }
 0x1c6   :  { %v216_v41 = vadd.f32 %v215_v40, %v167_v39  ;;  %v392_v42 = vpop.f32.mrb[3].mxu1  ;;  %v219_v43 = vmax.f32 %v213_v37, 0.0 }
 0x1c8   :  { %v220_v44 = vmax.f32 %v216_v41, 0.0 }
 0x1ca   :  { %v222_v45 = vpack.c.bf16 %v220_v44, %v219_v43 }
 0x1cc   :  { %394 = vmatpush3.bf16.msra.mxu0 %v222_v45 }
 0x1cf   :  { %396 = vmatmul.mubr.msk.bf16.vlgmr.msra.gmra.mrb[4].mxu0 %vm229_vm4, %v221_v46 }
 0x2a2   :  { %v267_v48 = vpop.f32.mrb[4].mxu0 }
 0x2a3   :  { %v268_v49 = vadd.f32 %v267_v48, %v227_v47  ;;  %v397_v50 = vpop.f32.mrb[5].mxu0 }
 0x2a4   :  { %v270_v51 = vpop.f32.mrb[6].mxu0 }
 0x2a5   :  { %v273_v52 = vmax.f32 %v268_v49, 0.0  ;;  %v398_v53 = vpop.f32.mrb[7].mxu0 }
 0x2a7   :  { %v275_v54 = vpack.c.bf16 %v273_v52, %v273_v52 }
 0x2a9   :  { %v292_v55 = vsel %vm290_vm5, %v275_v54, 0 }
 0x2aa   :  { %400 = vmatpush3.bf16.msra.mxu1 %v292_v55 }
 0x2ad   :  { %402 = vmatmul.mubr.msk.bf16.vlgmr.msra.gmra.mrb[4].mxu1 %vm286_vm6, %v274_v56 }
 0x380   :  { %v328_v62 = vpop.f32.mrb[4].mxu1 }
 0x381   :  { %v329_v63 = vadd.f32 %v328_v62, %v285_v61  ;;  %v403_v0 = vpop.f32.mrb[5].mxu1 }
 0x382   :  { %v331_v1 = vpop.f32.mrb[6].mxu1 }
 0x383   :  { %v365_v2 = vmul.f32 -1.442695, %v329_v63  ;;  %v404_v3 = vpop.f32.mrb[7].mxu1 }
 0x385   :  { %417 = vpow2.f32 %v365_v2 }
 0x38f   :  { %v418_v4 = vpop.eup %417 }
 0x390   :  { %v337_v5 = vadd.f32 1.0, %v418_v4 }
 0x392   :  { %419 = vrcp.f32 %v337_v5 }
 0x39c   :  { %v420_v6 = vpop.eup %419 }
 0x39d   :  { %340 = vst [vmem:[#allocation3] sm:$0x1] %v420_v6 }
 0x39e   :  { %432 = shalt.err (!%p429_p4)
}
 0x39f   :  { %s433_s15 = scalar_lea.hbm %s570_s9, 16 }
 0x3a0   :  { %p434_p5 = scmp.ne.s32.totalorder %s570_s9, %s433_s15  ;;  %p437_p6 = scmp.lt.u32.totalorder %s433_s15, %s570_s9 }
 0x3a2   :  { %p439_p7 = pnand %p437_p6, %p434_p5 }
 0x3a4   :  { %442 = shalt.err (!%p439_p7)
}
 0x3a5   :  { %350 = dma.vmem_to_hbm [thread:$0]  %s348_s11, 16, %s570_s9, [#allocation4]  }
 0x3a6   :  { %443 = dma.done.wait [#allocation4], 16  }
 0x3a7   :  { %444 = vsyncadd [#allocation4], 4294967280 }
 0x3a8   :  { %354 = vsyncpa [#allocation4], 1 }

</bundles_post_ra>
